<compile_context>
chip_gen: v7x
topology: tpu7x:2x2x1
jax: 0.10.0
libtpu: 0.0.40
codegen_flags: <defaults>
</compile_context>

<pallas_src>
import functools

import jax
import jax.numpy as jnp
import numpy as np
from jax.experimental import pallas as pl
from jax.experimental.pallas import tpu as pltpu


def _tile(dim, target, align):
    """Largest `align`-multiple divisor of `dim` that is <= target, else dim."""
    if dim <= target:
        return dim
    t = (target // align) * align
    while t >= align:
        if dim % t == 0:
            return t
        t -= align
    return dim


# -----------------------------------------------------------------------------
# Tiled linear projection: out = x @ W + b     (x: (N, Din), W: (Din, Dout))
# -----------------------------------------------------------------------------
def _linear_kernel(x_ref, w_ref, b_ref, o_ref, acc_ref):
    @pl.when(pl.program_id(2) == 0)
    def _init():
        acc_ref[...] = jnp.zeros_like(acc_ref)

    acc_ref[...] += jnp.dot(x_ref[...], w_ref[...],
                            preferred_element_type=jnp.float32)

    @pl.when(pl.program_id(2) == pl.num_programs(2) - 1)
    def _finalize():
        o_ref[...] = (acc_ref[...] + b_ref[...]).astype(o_ref.dtype)


def linear(x2d, w, b, *, tm_target=512, tn_target=512, tk_target=512):
    N, Din = x2d.shape
    Dout = w.shape[1]
    tm = _tile(N, tm_target, 8)
    tn = _tile(Dout, tn_target, 128)
    tk = _tile(Din, tk_target, 128)
    grid = (N // tm, Dout // tn, Din // tk)
    return pl.pallas_call(
        _linear_kernel,
        out_shape=jax.ShapeDtypeStruct((N, Dout), x2d.dtype),
        grid=grid,
        in_specs=[
            pl.BlockSpec((tm, tk), lambda i, j, k: (i, k)),
            pl.BlockSpec((tk, tn), lambda i, j, k: (k, j)),
            pl.BlockSpec((1, tn), lambda i, j, k: (0, j)),
        ],
        out_specs=pl.BlockSpec((tm, tn), lambda i, j, k: (i, j)),
        scratch_shapes=[pltpu.VMEM((tm, tn), jnp.float32)],
        compiler_params=pltpu.CompilerParams(
            dimension_semantics=("parallel", "parallel", "arbitrary"),
            vmem_limit_bytes=48 * 1024 * 1024),
    )(x2d, w, b.reshape(1, Dout))


# -----------------------------------------------------------------------------
# Layer-wise attention core kernel (flash-style over the concatenated key axis).
#   grid = (head_block hb, query_block qi, kv)  with kv = layer * C + chunk.
#   Per step: (TB heads, TQ queries) vs one (TK, TB, Dh) key/value chunk.
#   Online softmax state is per-LAYER (reset at the first chunk of each layer);
#   at a layer's last chunk the normalized, layer-weighted contribution is
#   added to a cross-layer accumulator, which is stored once at the end.
# -----------------------------------------------------------------------------
def _lwa_kernel(lw_ref, q_ref, k_ref, v_ref, o_ref,
                m_sc, l_sc, acc_sc, out_sc, *, chunks_per_layer):
    kv = pl.program_id(2)
    n_kv = pl.num_programs(2)
    layer = kv // chunks_per_layer          # which layer this KV chunk belongs to
    kc = kv % chunks_per_layer              # chunk position inside the layer

    @pl.when(kv == 0)
    def _init_output_acc():
        out_sc[...] = jnp.zeros_like(out_sc)

    @pl.when(kc == 0)
    def _init_layer_state():
        m_sc[...] = jnp.full(m_sc.shape, -jnp.inf, jnp.float32)
        l_sc[...] = jnp.zeros_like(l_sc)
        acc_sc[...] = jnp.zeros_like(acc_sc)

    # Head-major views (swap of the two major axes; minor/lane dim Dh fixed,
    # so these are sublane-only copies on slots the MXU leaves idle).
    qh = pltpu.einshape("qtd->tqd", q_ref[...])      # (TB, TQ, Dh)
    kh = pltpu.einshape("ktd->tkd", k_ref[...])      # (TB, TK, Dh)
    vh = pltpu.einshape("ktd->tkd", v_ref[...])      # (TB, TK, Dh)

    # Scores: q is pre-scaled (1/sqrt(Dh) folded into the Q projection).
    # MXU consumes native dtype; accumulation in f32.
    # TODO(synk): with Dh <= 64 the MXU contraction is only 25% (v6e/v7x) /
    # 50% (v5e) utilized; packing 2 heads per contraction would double it.
    s = jnp.einsum("bqd,bkd->bqk", qh, kh,
                   preferred_element_type=jnp.float32)        # (TB, TQ, TK)

    # Online (per-layer) softmax update for this chunk.
    m_prev = m_sc[...]
    m_new = jnp.maximum(m_prev, s.max(axis=-1, keepdims=True))
    alpha = jnp.exp(m_prev - m_new)
    p = jnp.exp(s - m_new)                                    # (TB, TQ, TK)
    l_sc[...] = alpha * l_sc[...] + p.sum(axis=-1, keepdims=True)
    acc_sc[...] = alpha * acc_sc[...] + jnp.einsum(
        "bqk,bkd->bqd", p.astype(vh.dtype), vh,
        preferred_element_type=jnp.float32)                   # (TB, TQ, Dh)
    m_sc[...] = m_new

    # Last chunk of this layer: normalize (per-layer softmax) and accumulate
    # the layer-weighted contribution.  l_sc >= exp(0) = 1, so no div-by-zero.
    @pl.when(kc == chunks_per_layer - 1)
    def _finish_layer():
        inv = pl.reciprocal(l_sc[...], approx=True)           # EUP slot
        out_sc[...] += (lw_ref[layer] * inv) * acc_sc[...]

    # Last chunk overall: one full-tile, lane-dense store in (TQ, TB, Dh).
    @pl.when(kv == n_kv - 1)
    def _store():
        o_ref[...] = pltpu.einshape("tqd->qtd", out_sc[...]).astype(o_ref.dtype)


# -----------------------------------------------------------------------------
# Full forward pass.
# -----------------------------------------------------------------------------
def layer_wise_attention(x, layer_outputs, params, num_heads):
    S, B, D = x.shape
    H = num_heads
    Dh = D // H
    BH = B * H
    L = 1 + len(layer_outputs)
    scaling = float(Dh) ** (-0.5)

    # --- projections (tiled Pallas matmuls) ---------------------------------
    x2d = x.reshape(S * B, D)
    # Fold the attention scaling into the Q projection (zero runtime cost).
    q = linear(x2d, params["wq"] * scaling, params["bq"] * scaling)
    q = q.reshape(S, BH, Dh)

    # Fused K / V projections over [x] + layer_outputs (one matmul each).
    stacked_in = jnp.concatenate(
        [x[None]] + [p[None] for p in layer_outputs], axis=0)      # (L, S, B, D)
    in2d = stacked_in.reshape(L * S * B, D)
    k = linear(in2d, params["wk"], params["bk"]).reshape(L * S, BH, Dh)
    v = linear(in2d, params["wv"], params["bv"]).reshape(L * S, BH, Dh)

    lw = jax.nn.softmax(params["layer_weights"][:L])   # (L,) scalars -> SMEM

    # --- tiling --------------------------------------------------------------
    # TB (heads/step): 16-row granularity for bf16 sublane packing, 8 for f32.
    # Keeping TB small keeps BH//TB >= 2 so the leading "parallel" head axis
    # can shard across both TensorCores on v7x, and each strided K/V DMA row
    # is TB*Dh*bytes (>= 2 KiB at Dh=64).
    sub_align = 16 if q.dtype == jnp.bfloat16 else 8
    TB = _tile(BH, sub_align, sub_align)
    TQ = _tile(S, 128, 8)           # query rows per step
    TK = _tile(S, 512, 8)           # KV-chunk length (flash-style key tiling)
    chunks_per_layer = S // TK
    grid = (BH // TB, S // TQ, L * chunks_per_layer)

    out = pl.pallas_call(
        functools.partial(_lwa_kernel, chunks_per_layer=chunks_per_layer),
        out_shape=jax.ShapeDtypeStruct((S, BH, Dh), x.dtype),
        grid=grid,
        in_specs=[
            pl.BlockSpec(memory_space=pltpu.MemorySpace.SMEM),              # layer weights
            pl.BlockSpec((TQ, TB, Dh), lambda hb, qi, kv: (qi, hb, 0)),     # Q
            pl.BlockSpec((TK, TB, Dh), lambda hb, qi, kv: (kv, hb, 0)),     # K chunk
            pl.BlockSpec((TK, TB, Dh), lambda hb, qi, kv: (kv, hb, 0)),     # V chunk
        ],
        out_specs=pl.BlockSpec((TQ, TB, Dh), lambda hb, qi, kv: (qi, hb, 0)),
        scratch_shapes=[
            pltpu.VMEM((TB, TQ, 1), jnp.float32),     # running per-layer max
            pltpu.VMEM((TB, TQ, 1), jnp.float32),     # running per-layer denom
            pltpu.VMEM((TB, TQ, Dh), jnp.float32),    # per-layer numerator acc
            pltpu.VMEM((TB, TQ, Dh), jnp.float32),    # cross-layer output acc
        ],
        compiler_params=pltpu.CompilerParams(
            dimension_semantics=("parallel", "parallel", "arbitrary"),
            vmem_limit_bytes=48 * 1024 * 1024),
    )(lw, q, k, v)

    combined = out.reshape(S * B, D)                  # free view (head-major in D)
    y = linear(combined, params["wo"], params["bo"])
    return y.reshape(S, B, D)


# -----------------------------------------------------------------------------
# Pure-JAX reference mirroring the PyTorch forward exactly (for validation).
# -----------------------------------------------------------------------------
def reference(x, layer_outputs, params, num_heads):
    S, B, D = x.shape
    H = num_heads
    Dh = D // H
    scaling = float(Dh) ** (-0.5)

    def lin(y, w, b):
        return y @ w + b

    def proj(y, w, b):
        return lin(y, w, b).reshape(S, B * H, Dh)

    q = proj(x, params["wq"], params["bq"])

    def scores_of(k):
        return jnp.einsum("sbd,tbd->bst", q, k) * scaling

    all_scores = [scores_of(proj(x, params["wk"], params["bk"]))]
    all_values = [proj(x, params["wv"], params["bv"])]
    for prev in layer_outputs:
        all_scores.append(scores_of(proj(prev, params["wk"], params["bk"])))
        all_values.append(proj(prev, params["wv"], params["bv"]))

    L = len(all_scores)
    stacked = jnp.stack(all_scores, axis=-1)                   # (BH, Sq, Sk, L)
    attn = jax.nn.softmax(stacked, axis=-2)
    lw = jax.nn.softmax(params["layer_weights"][:L])
    attn = attn * lw.reshape(1, 1, 1, -1)
    combined = sum(
        jnp.einsum("bst,tbd->bsd", attn[..., i], all_values[i]) for i in range(L)
    )
    combined = jnp.transpose(combined, (1, 0, 2)).reshape(S, B, D)
    return lin(combined, params["wo"], params["bo"])


# -----------------------------------------------------------------------------
if __name__ == "__main__":
    S, B, D, H = 8, 2, 32, 4
    MAX_LAYERS = 3
    NUM_PREV = 2  # two previous layer outputs -> L = 3

    key = jax.random.PRNGKey(0)
    keys = jax.random.split(key, 12)

    def w_init(k):
        return jax.random.normal(k, (D, D), jnp.float32) * 0.05

    def b_init(k):
        return jax.random.normal(k, (D,), jnp.float32) * 0.01

    params = {
        "wq": w_init(keys[0]), "bq": b_init(keys[1]),
        "wk": w_init(keys[2]), "bk": b_init(keys[3]),
        "wv": w_init(keys[4]), "bv": b_init(keys[5]),
        "wo": w_init(keys[6]), "bo": b_init(keys[7]),
        "layer_weights": jnp.ones((MAX_LAYERS + 1,), jnp.float32),
    }

    x = jax.random.normal(keys[8], (S, B, D), jnp.float32)
    layer_outputs = [
        jax.random.normal(keys[9 + i], (S, B, D), jnp.float32)
        for i in range(NUM_PREV)
    ]

    out = layer_wise_attention(x, layer_outputs, params, H)
    out = jax.block_until_ready(out)

    ref = reference(x, layer_outputs, params, H)
    np.testing.assert_allclose(np.asarray(out), np.asarray(ref),
                               rtol=1e-3, atol=1e-3)

    print("KERNEL_OK")
</pallas_src>

<mosaic_0001>
module attributes {stable_mosaic.version = 11 : i64} {
  func.func @_linear_kernel(%arg0: i32, %arg1: i32, %arg2: i32, %arg3: memref<16x32xf32, #tpu.memory_space<vmem>>, %arg4: memref<32x32xf32, #tpu.memory_space<vmem>>, %arg5: memref<1x32xf32, #tpu.memory_space<vmem>>, %arg6: memref<16x32xf32, #tpu.memory_space<vmem>>, %arg7: memref<16x32xf32, #tpu.memory_space<vmem>>) attributes {dimension_semantics = [#tpu.dimension_semantics<parallel>, #tpu.dimension_semantics<parallel>, #tpu.dimension_semantics<arbitrary>], iteration_bounds = array<i64: 1, 1, 1>, scalar_prefetch = 0 : i64, scratch_operands = 1 : i64, tpu.core_type = #tpu.core_type<tc>, window_params = [{transform_indices = @transform_0, window_bounds = array<i64: 16, 32>}, {transform_indices = @transform_1, window_bounds = array<i64: 32, 32>}, {transform_indices = @transform_2, window_bounds = array<i64: 1, 32>}, {transform_indices = @transform_3, window_bounds = array<i64: 16, 32>}]} {
    %c0_i32 = arith.constant 0 : i32
    %0 = arith.cmpi eq, %arg2, %c0_i32 : i32
    %1 = arith.extui %0 : i1 to i32
    %c0_i32_0 = arith.constant 0 : i32
    %2 = arith.cmpi ne, %1, %c0_i32_0 : i32
    scf.if %2 {
      %cst_10 = arith.constant 0.000000e+00 : f32
      %12 = vector.broadcast %cst_10 : f32 to vector<16x32xf32>
      %c0_11 = arith.constant 0 : index
      %c0_12 = arith.constant 0 : index
      %13 = vector.load %arg7[%c0_11, %c0_12] : memref<16x32xf32, #tpu.memory_space<vmem>>, vector<16x32xf32>
      tpu.vector_store %arg7[%c0_11, %c0_12], %12 {strides = array<i32>} : memref<16x32xf32, #tpu.memory_space<vmem>>, vector<16x32xf32>,
    } else {
    }
    %c0 = arith.constant 0 : index
    %c0_1 = arith.constant 0 : index
    %3 = vector.load %arg7[%c0, %c0_1] : memref<16x32xf32, #tpu.memory_space<vmem>>, vector<16x32xf32>
    %c0_2 = arith.constant 0 : index
    %c0_3 = arith.constant 0 : index
    %4 = vector.load %arg3[%c0_2, %c0_3] : memref<16x32xf32, #tpu.memory_space<vmem>>, vector<16x32xf32>
    %c0_4 = arith.constant 0 : index
    %c0_5 = arith.constant 0 : index
    %5 = vector.load %arg4[%c0_4, %c0_5] : memref<32x32xf32, #tpu.memory_space<vmem>>, vector<32x32xf32>
    %cst = arith.constant dense<0.000000e+00> : vector<16x32xf32>
    %6 = tpu.matmul %4, %5, %cst {dimension_numbers = #tpu.dot_dimension_numbers<[1], [0], [0], [1], [0, 0, 1, 1], [], []>} : vector<16x32xf32>, vector<32x32xf32>, vector<16x32xf32> -> vector<16x32xf32>
    %7 = arith.addf %3, %6 : vector<16x32xf32>
    %c0_6 = arith.constant 0 : index
    %c0_7 = arith.constant 0 : index
    %8 = vector.load %arg7[%c0_6, %c0_7] : memref<16x32xf32, #tpu.memory_space<vmem>>, vector<16x32xf32>
    tpu.vector_store %arg7[%c0_6, %c0_7], %7 {strides = array<i32>} : memref<16x32xf32, #tpu.memory_space<vmem>>, vector<16x32xf32>,
    %c0_i32_8 = arith.constant 0 : i32
    %9 = arith.cmpi eq, %arg2, %c0_i32_8 : i32
    %10 = arith.extui %9 : i1 to i32
    %c0_i32_9 = arith.constant 0 : i32
    %11 = arith.cmpi ne, %10, %c0_i32_9 : i32
    scf.if %11 {
      %c0_10 = arith.constant 0 : index
      %c0_11 = arith.constant 0 : index
      %12 = vector.load %arg7[%c0_10, %c0_11] : memref<16x32xf32, #tpu.memory_space<vmem>>, vector<16x32xf32>
      %c0_12 = arith.constant 0 : index
      %c0_13 = arith.constant 0 : index
      %13 = vector.load %arg5[%c0_12, %c0_13] : memref<1x32xf32, #tpu.memory_space<vmem>>, vector<1x32xf32>
      %14 = vector.broadcast %13 : vector<1x32xf32> to vector<16x32xf32>
      %15 = arith.addf %12, %14 : vector<16x32xf32>
      %c0_14 = arith.constant 0 : index
      %c0_15 = arith.constant 0 : index
      %16 = vector.load %arg6[%c0_14, %c0_15] : memref<16x32xf32, #tpu.memory_space<vmem>>, vector<16x32xf32>
      tpu.vector_store %arg6[%c0_14, %c0_15], %15 {strides = array<i32>} : memref<16x32xf32, #tpu.memory_space<vmem>>, vector<16x32xf32>,
    } else {
    }
    return
  }
  func.func @transform_0(%arg0: i32, %arg1: i32, %arg2: i32) -> (i32, i32) {
    %c0_i32 = arith.constant 0 : i32
    return %arg0, %arg2 : i32, i32
  }
  func.func @transform_1(%arg0: i32, %arg1: i32, %arg2: i32) -> (i32, i32) {
    %c0_i32 = arith.constant 0 : i32
    return %arg2, %arg1 : i32, i32
  }
  func.func @transform_2(%arg0: i32, %arg1: i32, %arg2: i32) -> (i32, i32) {
    %c0_i32 = arith.constant 0 : i32
    %c0_i32_0 = arith.constant 0 : i32
    return %c0_i32, %arg1 : i32, i32
  }
  func.func @transform_3(%arg0: i32, %arg1: i32, %arg2: i32) -> (i32, i32) {
    %c0_i32 = arith.constant 0 : i32
    return %arg0, %arg1 : i32, i32
  }
}

</mosaic_0001>

<bundles_post_ra>
// kernel: tpu_custom_call.1
= control target key start
LH: loop header
LB: loop body
LE: loop exit
PB: predicated region body
PF: predicated region fallthrough
CT: control target
= control target key end

     0   :  { %8 = vsyncpa [#allocation4], 0  ;;  %s366_s0 = inlined_call_operand.hbm [shape: f32[16,32], index: 0, kind: input, shape index: {}]   ;;  %s367_s1 = inlined_call_operand.hbm [shape: f32[32,32], index: 1, kind: input, shape index: {}]   ;;  %s368_s2 = inlined_call_operand.vmem [shape: f32[1,32], index: 2, kind: input, shape index: {}]   ;;  %s369_s3 = inlined_call_operand.hbm [shape: f32[16,32], index: 3, kind: output, shape index: {}]  }
   0x1   :  { %9 = vsyncpa [#allocation7], 0 }
   0x2   :  { %10 = vsyncpa [#allocation5], 0  ;;  %s284_s12 = smov [#allocation3]   ;;  %s212_s16 = scalar_lea.hbm %s366_s0, 256 }
   0x3   :  { %s16_s13 = sshll.u32 %s284_s12, 4  ;;  %p213_p0 = scmp.ne.s32.totalorder %s366_s0, %s212_s16  ;;  %s17_s13 = int_to_ptr.vmem [resolvable:$true] %s16_s13 }
   0x4   :  { %p216_p1 = scmp.lt.u32.totalorder %s212_s16, %s366_s0 }
   0x6   :  { %p218_p2 = pnand %p216_p1, %p213_p0 }
   0x8   :  { %221 = shalt.err (!%p218_p2)
}
   0x9   :  { %s222_s21 = scalar_lea.vmem %s17_s13, 256  ;;  %p227_p4 = scmp.lt.s32.totalorder %s17_s13, %s17_s13 }
   0xa   :  { %p223_p3 = scmp.ne.s32.totalorder %s17_s13, %s222_s21  ;;  %p228_p5 = scmp.lt.s32.totalorder %s222_s21, %s222_s21 }
   0xc   :  { %p229_p6 = por %p228_p5, %p227_p4 }
   0xe   :  { %p230_p7 = pnand %p229_p6, %p223_p3 }
  0x10   :  { %233 = shalt.err (!%p230_p7)
}
  0x11   :  { %s285_s22 = smov 128   ;;  %s286_s23 = smov 8  }
  0x12   :  { %22 = dma.hbm_to_vmem [thread:$0]  %s366_s0, 256, %s17_s13, [#allocation4], %s285_s22, %s285_s22, %s286_s23  }
  0x13   :  { %s287_s26 = smov [#allocation6]   ;;  %s234_s30 = scalar_lea.hbm %s367_s1, 512 }
  0x14   :  { %s28_s27 = sshll.u32 %s287_s26, 4  ;;  %p235_p8 = scmp.ne.s32.totalorder %s367_s1, %s234_s30  ;;  %s29_s27 = int_to_ptr.vmem [resolvable:$true] %s28_s27 }
  0x15   :  { %p238_p9 = scmp.lt.u32.totalorder %s234_s30, %s367_s1 }
  0x17   :  { %p240_p10 = pnand %p238_p9, %p235_p8 }
  0x19   :  { %243 = shalt.err (!%p240_p10)
}
  0x1a   :  { %s244_s8 = scalar_lea.vmem %s29_s27, 512  ;;  %p249_p12 = scmp.lt.s32.totalorder %s29_s27, %s29_s27 }
  0x1b   :  { %p245_p11 = scmp.ne.s32.totalorder %s29_s27, %s244_s8  ;;  %p250_p13 = scmp.lt.s32.totalorder %s244_s8, %s244_s8 }
  0x1d   :  { %p251_p0 = por %p250_p13, %p249_p12 }
  0x1f   :  { %p252_p1 = pnand %p251_p0, %p245_p11 }
  0x21   :  { %255 = shalt.err (!%p252_p1)
}
  0x22   :  { %34 = dma.hbm_to_vmem [thread:$0]  %s367_s1, 512, %s29_s27, [#allocation7], %s285_s22, %s285_s22, %s286_s23  }
  0x23   :  { %278 = dma.done.wait [#allocation4], 256  }
  0x24   :  { %279 = vsyncadd [#allocation4], 4294967040 }
  0x25   :  { %280 = dma.done.wait [#allocation7], 512  }
  0x26   :  { %281 = vsyncadd [#allocation7], 4294966784  ;;  %vm47_vm0 = vcmask 261120   ;;  %v288_v0 = vmov 0.0   ;;  %v54_v1 = vld [vmem:[#allocation6] sm:$0xff]  ;;  %v55_v2 = vld [vmem:[#allocation6 + $0x8] sm:$0xff] }
  0x27   :  { %49 = vst.msk [vmem:[#allocation2 + $0x8] sm:$0xff] %vm47_vm0, %v288_v0  ;;  %48 = vst.msk [vmem:[#allocation2] sm:$0xff] %vm47_vm0, %v288_v0  ;;  %v56_v3 = vld [vmem:[#allocation6 + $0x10] sm:$0xff]  ;;  %v198_v4 = vpack.c.bf16 %v55_v2, %v54_v1  ;;  %v57_v5 = vld [vmem:[#allocation6 + $0x18] sm:$0xff]  ;;  %s289_s11 = smov [#allocation8]  }
  0x28   :  { %v52_v6 = vld [vmem:[#allocation3] sm:$0xff]  ;;  %v202_v7 = vpack.c.bf16 %v57_v5, %v56_v3  ;;  %v53_v8 = vld [vmem:[#allocation3 + $0x8] sm:$0xff]  ;;  %v180_v15 = vld [vmem:[%s368_s2] ss:$0 sm:$0xff]  ;;  %s165_s12 = sshll.u32 %s289_s11, 4  ;;  %s166_s12 = int_to_ptr.vmem [resolvable:$true] %s165_s12 }
  0x29   :  { %195 = vmatprep.mubr.msk.f32.mxu0 %vm47_vm0, %v52_v6  ;;  %199 = vmatprep.subr.bf16.mxu0 %v198_v4  ;;  %s256_s13 = scalar_lea.vmem %s166_s12, 256  ;;  %p261_p3 = scmp.lt.s32.totalorder %s166_s12, %s166_s12 }
  0x2a   :  { %201 = vmatpush3.bf16.msra.mxu0 %v198_v4  ;;  %p257_p2 = scmp.ne.s32.totalorder %s166_s12, %s256_s13  ;;  %p262_p4 = scmp.lt.s32.totalorder %s256_s13, %s256_s13 }
  0x2b   :  { %203 = vmatprep.subr.bf16.mxu0 %v202_v7 }
  0x2c   :  { %p263_p5 = por %p262_p4, %p261_p3 }
  0x2e   :  { %205 = vmatpush3.bf16.msra.mxu0 %v202_v7  ;;  %v51_v9 = vld [vmem:[#allocation2 + $0x8] sm:$0xff]  ;;  %v50_v10 = vld [vmem:[#allocation2] sm:$0xff]  ;;  %p264_p6 = pnand %p263_p5, %p257_p2 }
  0x31   :  { %196 = vmatmul.mubr.msk.f32.vlgmr.msra.gmra.mrb[0].mxu0 %vm47_vm0, %v53_v8 }
 0x104   :  { %v197_v11 = vpop.f32.mrb[0].mxu0 }
 0x105   :  { %v141_v12 = vadd.f32 %v197_v11, %v51_v9  ;;  %v131_v13 = vpop.f32.mrb[1].mxu0 }
 0x106   :  { %v140_v14 = vadd.f32 %v131_v13, %v50_v10 }
 0x107   :  { %143 = vst.msk [vmem:[#allocation2 + $0x8] sm:$0xff] %vm47_vm0, %v141_v12 }
 0x108   :  { %142 = vst.msk [vmem:[#allocation2] sm:$0xff] %vm47_vm0, %v140_v14 }
 0x10e   :  { %v148_v16 = vld [vmem:[#allocation2 + $0x8] sm:$0xff] }
 0x10f   :  { %v147_v17 = vld [vmem:[#allocation2] sm:$0xff]  ;;  %v157_v18 = vadd.f32 %v180_v15, %v148_v16 }
 0x110   :  { %v156_v19 = vadd.f32 %v180_v15, %v147_v17 }
 0x111   :  { %159 = vst.msk [vmem:[#allocation8 + $0x8] sm:$0xff] %vm47_vm0, %v157_v18 }
 0x112   :  { %158 = vst.msk [vmem:[#allocation8] sm:$0xff] %vm47_vm0, %v156_v19 }
 0x113   :  { %267 = shalt.err (!%p264_p6)
}
 0x114   :  { %s268_s15 = scalar_lea.hbm %s369_s3, 256 }
 0x115   :  { %p269_p7 = scmp.ne.s32.totalorder %s369_s3, %s268_s15  ;;  %p272_p8 = scmp.lt.u32.totalorder %s268_s15, %s369_s3 }
 0x117   :  { %p274_p9 = pnand %p272_p8, %p269_p7 }
 0x119   :  { %277 = shalt.err (!%p274_p9)
}
 0x11a   :  { %171 = dma.vmem_to_hbm [thread:$0]  %s166_s12, 256, %s369_s3, [#allocation5], %s285_s22, %s285_s22, %s286_s23  }
 0x11b   :  { %282 = dma.done.wait [#allocation5], 256  }
 0x11c   :  { %283 = vsyncadd [#allocation5], 4294967040 }
 0x11d   :  { %175 = vsyncpa [#allocation4], 1 }
 0x11e   :  { %176 = vsyncpa [#allocation7], 1 }
 0x11f   :  { %177 = vsyncpa [#allocation5], 1 }

</bundles_post_ra>
